<compile_context>
chip_gen: v6e
topology: v6e:2x2x1
jax: 0.10.0
libtpu: 0.0.40
codegen_flags: <defaults>
</compile_context>

<pallas_src>
import jax
import jax.numpy as jnp
from jax.experimental import pallas as pl
from jax.experimental.pallas import tpu as pltpu


LANES = 128          # vreg lane width (fast axis)
MAX_ROW_TILE = 2048  # rows per grid step: 2048 x 128 x 4B = 1 MiB f32 block


def _h_swish_kernel(x_ref, o_ref):
    x = x_ref[...]
    one_sixth = jnp.asarray(1.0 / 6.0, dtype=x.dtype)
    half = jnp.asarray(0.5, dtype=x.dtype)
    # h_sigmoid(x) = relu6(x+3)/6 == clip(x/6 + 0.5, 0, 1)
    hsig = jnp.clip(x * one_sixth + half, 0, 1)
    o_ref[...] = (x * hsig).astype(o_ref.dtype)


def _run_2d(x2d, row_tile):
    rows = x2d.shape[0]
    grid = (pl.cdiv(rows, row_tile),)
    return pl.pallas_call(
        _h_swish_kernel,
        out_shape=jax.ShapeDtypeStruct(x2d.shape, x2d.dtype),
        grid_spec=pltpu.PrefetchScalarGridSpec(
            num_scalar_prefetch=0,
            grid=grid,
            in_specs=[pl.BlockSpec((row_tile, LANES), lambda i: (i, 0))],
            out_specs=pl.BlockSpec((row_tile, LANES), lambda i: (i, 0)),
        ),
        compiler_params=pltpu.CompilerParams(
            dimension_semantics=("parallel",),
        ),
    )(x2d)


def h_swish(x):
    """Elementwise hard-swish. Accepts any shape (e.g. NCHW); returns same shape/dtype."""
    orig_shape = x.shape
    dtype = x.dtype
    n = x.size
    if n == 0:
        return x

    # Vreg-granularity alignment: 8 sublanes for 32-bit, 16 for bf16, 32 for int8/fp8.
    itemsize = jnp.dtype(dtype).itemsize
    row_align = 8 * max(1, 4 // itemsize)
    chunk = row_align * LANES

    flat = x.reshape(-1)
    pad = (-n) % chunk

    if pad == 0:
        # Fast path (common for conv activations): pure reshape, no extra HBM copies.
        rows = n // LANES
        row_tile = min(MAX_ROW_TILE, rows)
        out2d = _run_2d(flat.reshape(rows, LANES), row_tile)
        return out2d.reshape(orig_shape)

    # Ragged path: pad only to one vreg tile (<= chunk-1 elements of waste).
    flat = jnp.concatenate([flat, jnp.zeros((pad,), dtype=dtype)])
    rows = flat.shape[0] // LANES
    row_tile = min(MAX_ROW_TILE, rows)
    out2d = _run_2d(flat.reshape(rows, LANES), row_tile)
    return out2d.reshape(-1)[:n].reshape(orig_shape)


def _h_swish_ref(x):
    xf = x.astype(jnp.float32)
    return (xf * (jnp.clip(xf + 3.0, 0.0, 6.0) / 6.0)).astype(x.dtype)


if __name__ == "__main__":
    key = jax.random.PRNGKey(0)

    # NCHW input, as the PyTorch module would see (aligned -> fast path).
    x = jax.random.normal(key, (2, 4, 16, 16), dtype=jnp.float32) * 4.0
    out = jax.block_until_ready(h_swish(x))
    ref = _h_swish_ref(x)
    assert out.shape == x.shape and out.dtype == x.dtype
    assert jnp.allclose(out, ref, atol=1e-6, rtol=1e-6), "mismatch vs reference (aligned)"

    # Non-vreg-aligned shape exercises the ragged (pad + slice) path.
    y = jax.random.normal(jax.random.PRNGKey(1), (3, 5, 7), dtype=jnp.float32) * 4.0
    out_y = jax.block_until_ready(h_swish(y))
    ref_y = _h_swish_ref(y)
    assert out_y.shape == y.shape and out_y.dtype == y.dtype
    assert jnp.allclose(out_y, ref_y, atol=1e-6, rtol=1e-6), "mismatch vs reference (ragged)"

    print("KERNEL_OK")
</pallas_src>

<mosaic_0001>
module attributes {stable_mosaic.version = 11 : i64} {
  func.func @_h_swish_kernel(%arg0: i32, %arg1: memref<16x128xf32, #tpu.memory_space<vmem>>, %arg2: memref<16x128xf32, #tpu.memory_space<vmem>>) attributes {dimension_semantics = [#tpu.dimension_semantics<parallel>], iteration_bounds = array<i64: 1>, scalar_prefetch = 0 : i64, scratch_operands = 0 : i64, tpu.core_type = #tpu.core_type<tc>, window_params = [{transform_indices = @transform_0, window_bounds = array<i64: 16, 128>}, {transform_indices = @transform_1, window_bounds = array<i64: 16, 128>}]} {
    %c0 = arith.constant 0 : index
    %c0_0 = arith.constant 0 : index
    %0 = vector.load %arg1[%c0, %c0_0] : memref<16x128xf32, #tpu.memory_space<vmem>>, vector<16x128xf32>
    %cst = arith.constant 0.166666672 : f32
    %1 = vector.broadcast %cst : f32 to vector<16x128xf32>
    %2 = arith.mulf %0, %1 : vector<16x128xf32>
    %cst_1 = arith.constant 5.000000e-01 : f32
    %3 = vector.broadcast %cst_1 : f32 to vector<16x128xf32>
    %4 = arith.addf %2, %3 : vector<16x128xf32>
    %c0_i32 = arith.constant 0 : i32
    %c1_i32 = arith.constant 1 : i32
    %5 = arith.sitofp %c0_i32 : i32 to f32
    %6 = vector.broadcast %5 : f32 to vector<16x128xf32>
    %7 = arith.maximumf %6, %4 : vector<16x128xf32>
    %8 = arith.sitofp %c1_i32 : i32 to f32
    %9 = vector.broadcast %8 : f32 to vector<16x128xf32>
    %10 = arith.minimumf %9, %7 : vector<16x128xf32>
    %11 = arith.mulf %0, %10 : vector<16x128xf32>
    %c0_2 = arith.constant 0 : index
    %c0_3 = arith.constant 0 : index
    %12 = vector.load %arg2[%c0_2, %c0_3] : memref<16x128xf32, #tpu.memory_space<vmem>>, vector<16x128xf32>
    tpu.vector_store %arg2[%c0_2, %c0_3], %11 {strides = array<i32>} : memref<16x128xf32, #tpu.memory_space<vmem>>, vector<16x128xf32>,
    return
  }
  func.func @transform_0(%arg0: i32) -> (i32, i32) {
    %c0_i32 = arith.constant 0 : i32
    %c0_i32_0 = arith.constant 0 : i32
    return %arg0, %c0_i32 : i32, i32
  }
  func.func @transform_1(%arg0: i32) -> (i32, i32) {
    %c0_i32 = arith.constant 0 : i32
    %c0_i32_0 = arith.constant 0 : i32
    return %arg0, %c0_i32 : i32, i32
  }
}

</mosaic_0001>

<bundles_post_ra>
// kernel: tpu_custom_call.1
= control target key start
LH: loop header
LB: loop body
LE: loop exit
PB: predicated region body
PF: predicated region fallthrough
CT: control target
= control target key end

     0   :  { %6 = vsyncpa [#allocation3], 0  ;;  %s128_s0 = inlined_call_operand.hbm [shape: f32[16,128], index: 0, kind: input, shape index: {}]   ;;  %s129_s1 = inlined_call_operand.hbm [shape: f32[16,128], index: 1, kind: output, shape index: {}]  }
   0x1   :  { %7 = vsyncpa [#allocation4], 0  ;;  %s102_s6 = smov [#allocation2]  }
   0x2   :  { %s13_s7 = sshll.u32 %s102_s6, 4  ;;  %s14_s7 = int_to_ptr.vmem [resolvable:$true] %s13_s7 }
   0x3   :  { %s66_s8 = scalar_lea.vmem %s14_s7, 256  ;;  %p71_p1 = scmp.lt.s32.totalorder %s14_s7, %s14_s7 }
   0x4   :  { %p67_p0 = scmp.ne.s32.totalorder %s14_s7, %s66_s8  ;;  %p72_p2 = scmp.lt.s32.totalorder %s66_s8, %s66_s8 }
   0x6   :  { %p73_p3 = por %p72_p2, %p71_p1 }
   0x8   :  { %p74_p4 = pnand %p73_p3, %p67_p0 }
   0xa   :  { %77 = shalt.err (!%p74_p4)
}
   0xb   :  { %s103_s9 = smov 128   ;;  %s104_s10 = smov 8  }
   0xc   :  { %19 = dma.hbm_to_vmem [thread:$0]  %s128_s0, 256, %s14_s7, [#allocation3], %s103_s9, %s103_s9, %s104_s10  }
   0xd   :  { %98 = dma.done.wait [#allocation3], 256  }
   0xe   :  { %99 = vsyncadd [#allocation3], 4294967040  ;;  %v23_v0 = vld [vmem:[#allocation2] sm:$0xff]  ;;  %v24_v1 = vld [vmem:[#allocation2 + $0x8] sm:$0xff]  ;;  %s105_s13 = smov [#allocation5]  }
   0xf   :  { %v25_v2 = vmul.f32 0.16666667, %v23_v0  ;;  %v26_v3 = vmul.f32 0.16666667, %v24_v1  ;;  %s42_s14 = sshll.u32 %s105_s13, 4  ;;  %s43_s14 = int_to_ptr.vmem [resolvable:$true] %s42_s14 }
  0x10   :  { %s78_s0 = scalar_lea.vmem %s43_s14, 256  ;;  %p83_p6 = scmp.lt.s32.totalorder %s43_s14, %s43_s14 }
  0x11   :  { %v27_v4 = vadd.f32 0.5, %v25_v2  ;;  %v28_v5 = vadd.f32 0.5, %v26_v3  ;;  %p79_p5 = scmp.ne.s32.totalorder %s43_s14, %s78_s0  ;;  %p84_p7 = scmp.lt.s32.totalorder %s78_s0, %s78_s0 }
  0x13   :  { %v29_v6 = vmax.f32 %v27_v4, 0.0  ;;  %v30_v7 = vmax.f32 %v28_v5, 0.0  ;;  %p85_p8 = por %p84_p7, %p83_p6 }
  0x15   :  { %v31_v8 = vmin.f32 %v29_v6, 1.0  ;;  %v32_v9 = vmin.f32 %v30_v7, 1.0  ;;  %p86_p9 = pnand %p85_p8, %p79_p5 }
  0x17   :  { %v33_v10 = vmul.f32 %v31_v8, %v23_v0  ;;  %v34_v11 = vmul.f32 %v32_v9, %v24_v1 }
  0x19   :  { %35 = vst [vmem:[#allocation5] sm:$0xff] %v33_v10  ;;  %36 = vst [vmem:[#allocation5 + $0x8] sm:$0xff] %v34_v11 }
  0x1a   :  { %89 = shalt.err (!%p86_p9)
}
  0x1b   :  { %48 = dma.vmem_to_hbm [thread:$0]  %s43_s14, 256, %s129_s1, [#allocation4], %s103_s9, %s103_s9, %s104_s10  }
  0x1c   :  { %100 = dma.done.wait [#allocation4], 256  }
  0x1d   :  { %101 = vsyncadd [#allocation4], 4294967040 }
  0x1e   :  { %52 = vsyncpa [#allocation3], 1 }
  0x1f   :  { %53 = vsyncpa [#allocation4], 1 }

</bundles_post_ra>
